<compile_context>
chip_gen: v6e
topology: v6e:2x2x1
jax: 0.10.0
libtpu: 0.0.40
codegen_flags: <defaults>
</compile_context>

<pallas_src>
import functools

import jax
import jax.numpy as jnp
from jax.experimental import pallas as pl
from jax.experimental.pallas import tpu as pltpu


_SMEM_SPEC = pl.BlockSpec(memory_space=pltpu.MemorySpace.SMEM)
_VMEM_SPEC = pl.BlockSpec(memory_space=pltpu.MemorySpace.VMEM)


# ----------------------------- Pallas kernels ------------------------------ #

def _train_kernel(x_ref, eps_ref, sab_ref, s1mab_ref, isab_ref,
                  temb_ref, w_ref, b_ref, out_ref):
    """Fused DDPM forward noising + linear denoiser + x0 prediction.

    Single (gridless) invocation over the whole flattened batch.

    x_ref, eps_ref : VMEM (R, L)   R = B*D rows
    sab/s1mab/isab : VMEM (R, 1)   per-row sqrt(ab_t), sqrt(1-ab_t), 1/sqrt(ab_t)
    temb_ref       : VMEM (R, L)   per-row time embedding (gathered in wrapper)
    w_ref          : VMEM (L, L)
    b_ref          : VMEM (1, L)
    out_ref        : VMEM (R, L)
    """
    sab = sab_ref[...]
    s1mab = s1mab_ref[...]
    xt = sab * x_ref[...] + s1mab * eps_ref[...]                     # VPU
    eps_hat = (jnp.dot(xt, w_ref[...], preferred_element_type=jnp.float32)
               + b_ref[...] + temb_ref[...])                         # MXU + VPU
    out_ref[...] = ((xt - s1mab * eps_hat) * isab_ref[...]).astype(out_ref.dtype)


def _ddim_kernel(s1mab_ref, sabp_ref, s1mabp_ref, isab_ref,
                 noise_ref, w_ref, b_ref, temb_ref, out_ref):
    """All T deterministic (eta=0) DDIM reverse steps, statically unrolled.

    Single (gridless) invocation; x_t is carried as a loop value (no grid
    steps, no output-block-as-accumulator pattern, no pl.when init).

    s1mab/sabp/s1mabp/isab : SMEM (T,) f32 schedule tables (static-index reads)
    noise_ref              : VMEM (R, L)  initial x_T (aliased to out in HBM)
    w_ref / b_ref          : VMEM (L, L) / (1, L)
    temb_ref               : VMEM (T, L)  (static row slices)
    out_ref                : VMEM (R, L)  final x_0
    """
    T = temb_ref.shape[0]                     # static
    w = w_ref[...]
    b = b_ref[...]
    x = noise_ref[...]
    for t in range(T - 1, -1, -1):            # static unroll; t is a Python int
        temb_row = temb_ref[pl.ds(t, 1), :]                          # (1, L), static slice
        eps_hat = (jnp.dot(x, w, preferred_element_type=jnp.float32)
                   + b + temb_row)
        x0_hat = (x - s1mab_ref[t] * eps_hat) * isab_ref[t]
        x = sabp_ref[t] * x0_hat + s1mabp_ref[t] * eps_hat
    out_ref[...] = x.astype(out_ref.dtype)


# ------------------------------ pallas_call glue --------------------------- #

def _run_train(x0, eps, sab_c, s1mab_c, isab_c, temb_g, w, b):
    R, L = x0.shape
    flops = 2 * R * L * L + 6 * R * L
    bytes_accessed = 4 * (4 * R * L + 3 * R + L * L + L)
    return pl.pallas_call(
        _train_kernel,
        out_shape=jax.ShapeDtypeStruct((R, L), x0.dtype),
        in_specs=[_VMEM_SPEC] * 8,
        out_specs=_VMEM_SPEC,
        cost_estimate=pl.CostEstimate(flops=flops, transcendentals=0,
                                      bytes_accessed=bytes_accessed),
    )(x0, eps, sab_c, s1mab_c, isab_c, temb_g, w, b)


def _run_ddim(s1mab, sabp, s1mabp, isab, noise, w, b, temb):
    R, L = noise.shape
    T = temb.shape[0]
    flops = T * (2 * R * L * L + 8 * R * L)
    bytes_accessed = 4 * (2 * R * L + L * L + L + T * L + 4 * T)
    return pl.pallas_call(
        _ddim_kernel,
        out_shape=jax.ShapeDtypeStruct((R, L), noise.dtype),
        in_specs=[
            _SMEM_SPEC, _SMEM_SPEC, _SMEM_SPEC, _SMEM_SPEC,   # schedule tables
            _VMEM_SPEC,                                       # noise (aliased to out)
            _VMEM_SPEC,                                       # W
            _VMEM_SPEC,                                       # b
            _VMEM_SPEC,                                       # temb
        ],
        out_specs=_VMEM_SPEC,
        input_output_aliases={4: 0},                          # noise <-> output HBM buffer
        cost_estimate=pl.CostEstimate(flops=flops, transcendentals=0,
                                      bytes_accessed=bytes_accessed),
    )(s1mab, sabp, s1mabp, isab, noise, w, b, temb)


# ------------------------------ model wrapper ------------------------------ #

def init_diff_augmentation(key, seq_len, aug_time_steps):
    """Deterministic parameter init (synthetic denoiser, no checkpoint)."""
    kw, kb, kt = jax.random.split(key, 3)
    w = jax.random.normal(kw, (seq_len, seq_len), jnp.float32) / jnp.sqrt(
        jnp.float32(seq_len))
    b = 0.01 * jax.random.normal(kb, (1, seq_len), jnp.float32)
    temb = 0.1 * jax.random.normal(kt, (aug_time_steps, seq_len), jnp.float32)

    betas = jnp.linspace(1e-4, 2e-2, aug_time_steps, dtype=jnp.float32)
    alpha_bar = jnp.cumprod(1.0 - betas)
    alpha_bar_prev = jnp.concatenate(
        [jnp.ones((1,), jnp.float32), alpha_bar[:-1]])

    sab = jnp.sqrt(alpha_bar)
    return dict(
        w=w, b=b, temb=temb,
        sab=sab,                                   # sqrt(alpha_bar)
        s1mab=jnp.sqrt(1.0 - alpha_bar),           # sqrt(1 - alpha_bar)
        isab=1.0 / sab,                            # exact reciprocal (f32)
        sabp=jnp.sqrt(alpha_bar_prev),             # sqrt(alpha_bar_{t-1})
        s1mabp=jnp.sqrt(1.0 - alpha_bar_prev),     # sqrt(1 - alpha_bar_{t-1})
    )


@functools.partial(jax.jit, static_argnames=("task",))
def diff_augmentation_forward(params, x, key, *, task):
    """x: (B, seq_len, D) float32, mirroring the PyTorch forward(x, task)."""
    B, L, D = x.shape
    T = params["temb"].shape[0]
    w, b, temb = params["w"], params["b"], params["temb"]

    if task == "train":
        kt_, kn = jax.random.split(key)
        t = jax.random.randint(kt_, (B,), 0, T, dtype=jnp.int32)
        x0 = jnp.transpose(x, (0, 2, 1))                  # (B, D, L)
        eps = jax.random.normal(kn, x0.shape, x0.dtype)
        # Tiny per-sample gathers done once in the (jitted) wrapper; the kernel
        # body stays purely vectorized over the flattened (R, L) slab.
        t_row = jnp.repeat(t, D)                          # (R,) row -> t index
        sab_c = params["sab"][t_row][:, None]             # (R, 1)
        s1mab_c = params["s1mab"][t_row][:, None]         # (R, 1)
        isab_c = params["isab"][t_row][:, None]           # (R, 1)
        temb_g = temb[t_row]                              # (R, L)
        out = _run_train(x0.reshape(B * D, L), eps.reshape(B * D, L),
                         sab_c, s1mab_c, isab_c, temb_g, w, b)
        return out.reshape(B, D, L).transpose(0, 2, 1)    # (B, L, D)

    elif task in ("valid", "test"):
        # fast_sample_infill with an all-zero observation mask == plain DDIM
        # (eta = 0) sampling from pure noise of shape (B, seq_len, D).
        noise = jax.random.normal(key, (B * D, L), jnp.float32)
        out = _run_ddim(params["s1mab"], params["sabp"], params["s1mabp"],
                        params["isab"], noise, w, b, temb)
        return out.reshape(B, D, L).transpose(0, 2, 1)    # (B, L, D)

    else:
        raise ValueError(f"Invalid task: task={task!r}")


# --------------------------- pure-JAX references ---------------------------- #

def _ref_train(params, x, key):
    B, L, D = x.shape
    T = params["temb"].shape[0]
    kt_, kn = jax.random.split(key)
    t = jax.random.randint(kt_, (B,), 0, T, dtype=jnp.int32)
    x0 = jnp.transpose(x, (0, 2, 1))                      # (B, D, L)
    eps = jax.random.normal(kn, x0.shape, x0.dtype)
    sab = params["sab"][t][:, None, None]
    s1mab = params["s1mab"][t][:, None, None]
    xt = sab * x0 + s1mab * eps
    eps_hat = (jnp.einsum("bdl,lm->bdm", xt, params["w"],
                          precision=jax.lax.Precision.HIGHEST)
               + params["b"] + params["temb"][t][:, None, :])
    x0_hat = (xt - s1mab * eps_hat) / sab
    return x0_hat.transpose(0, 2, 1)


def _ref_forecast(params, x, key):
    B, L, D = x.shape
    T = params["temb"].shape[0]
    xr = jax.random.normal(key, (B * D, L), jnp.float32)
    for i in range(T - 1, -1, -1):
        eps_hat = (jnp.dot(xr, params["w"],
                           precision=jax.lax.Precision.HIGHEST)
                   + params["b"] + params["temb"][i][None, :])
        x0_hat = (xr - params["s1mab"][i] * eps_hat) / params["sab"][i]
        xr = params["sabp"][i] * x0_hat + params["s1mabp"][i] * eps_hat
    return xr.reshape(B, D, L).transpose(0, 2, 1)


# ---------------------------------- main ----------------------------------- #

if __name__ == "__main__":
    seq_len = 16
    aug_time_steps = 8
    B, D = 4, 1            # num_features = 1 in the reference configs

    key = jax.random.PRNGKey(0)
    kp, kx, kfwd1, kfwd2 = jax.random.split(key, 4)

    params = init_diff_augmentation(kp, seq_len, aug_time_steps)
    x = jax.random.normal(kx, (B, seq_len, D), jnp.float32)

    y_train = diff_augmentation_forward(params, x, kfwd1, task="train")
    y_test = diff_augmentation_forward(params, x, kfwd2, task="test")
    jax.block_until_ready((y_train, y_test))

    assert y_train.shape == (B, seq_len, D)
    assert y_test.shape == (B, seq_len, D)
    assert bool(jnp.all(jnp.isfinite(y_train)))
    assert bool(jnp.all(jnp.isfinite(y_test)))

    # Correctness against pure-JAX references (same RNG stream, loose tol to
    # absorb MXU vs XLA f32-matmul rounding differences).
    r_train = _ref_train(params, x, kfwd1)
    r_test = _ref_forecast(params, x, kfwd2)
    assert bool(jnp.allclose(y_train, r_train, rtol=2e-2, atol=2e-2))
    assert bool(jnp.allclose(y_test, r_test, rtol=2e-2, atol=2e-2))

    print("KERNEL_OK")
</pallas_src>

<mosaic_0001>
module attributes {stable_mosaic.version = 11 : i64} {
  func.func @_train_kernel(%arg0: memref<4x16xf32, #tpu.memory_space<vmem>>, %arg1: memref<4x16xf32, #tpu.memory_space<vmem>>, %arg2: memref<4x1xf32, #tpu.memory_space<vmem>>, %arg3: memref<4x1xf32, #tpu.memory_space<vmem>>, %arg4: memref<4x1xf32, #tpu.memory_space<vmem>>, %arg5: memref<4x16xf32, #tpu.memory_space<vmem>>, %arg6: memref<16x16xf32, #tpu.memory_space<vmem>>, %arg7: memref<1x16xf32, #tpu.memory_space<vmem>>, %arg8: memref<4x16xf32, #tpu.memory_space<vmem>>) attributes {dimension_semantics = [], scalar_prefetch = 0 : i64, scratch_operands = 0 : i64, tpu.core_type = #tpu.core_type<tc>} {
    %c0 = arith.constant 0 : index
    %c0_0 = arith.constant 0 : index
    %0 = vector.load %arg2[%c0, %c0_0] : memref<4x1xf32, #tpu.memory_space<vmem>>, vector<4x1xf32>
    %c0_1 = arith.constant 0 : index
    %c0_2 = arith.constant 0 : index
    %1 = vector.load %arg3[%c0_1, %c0_2] : memref<4x1xf32, #tpu.memory_space<vmem>>, vector<4x1xf32>
    %c0_3 = arith.constant 0 : index
    %c0_4 = arith.constant 0 : index
    %2 = vector.load %arg0[%c0_3, %c0_4] : memref<4x16xf32, #tpu.memory_space<vmem>>, vector<4x16xf32>
    %3 = vector.broadcast %0 : vector<4x1xf32> to vector<4x16xf32>
    %4 = arith.mulf %3, %2 : vector<4x16xf32>
    %c0_5 = arith.constant 0 : index
    %c0_6 = arith.constant 0 : index
    %5 = vector.load %arg1[%c0_5, %c0_6] : memref<4x16xf32, #tpu.memory_space<vmem>>, vector<4x16xf32>
    %6 = vector.broadcast %1 : vector<4x1xf32> to vector<4x16xf32>
    %7 = arith.mulf %6, %5 : vector<4x16xf32>
    %8 = arith.addf %4, %7 : vector<4x16xf32>
    %c0_7 = arith.constant 0 : index
    %c0_8 = arith.constant 0 : index
    %9 = vector.load %arg6[%c0_7, %c0_8] : memref<16x16xf32, #tpu.memory_space<vmem>>, vector<16x16xf32>
    %cst = arith.constant dense<0.000000e+00> : vector<4x16xf32>
    %10 = tpu.matmul %8, %9, %cst {dimension_numbers = #tpu.dot_dimension_numbers<[1], [0], [0], [1], [0, 0, 1, 1], [], []>} : vector<4x16xf32>, vector<16x16xf32>, vector<4x16xf32> -> vector<4x16xf32>
    %c0_9 = arith.constant 0 : index
    %c0_10 = arith.constant 0 : index
    %11 = vector.load %arg7[%c0_9, %c0_10] : memref<1x16xf32, #tpu.memory_space<vmem>>, vector<1x16xf32>
    %12 = vector.broadcast %11 : vector<1x16xf32> to vector<4x16xf32>
    %13 = arith.addf %10, %12 : vector<4x16xf32>
    %c0_11 = arith.constant 0 : index
    %c0_12 = arith.constant 0 : index
    %14 = vector.load %arg5[%c0_11, %c0_12] : memref<4x16xf32, #tpu.memory_space<vmem>>, vector<4x16xf32>
    %15 = arith.addf %13, %14 : vector<4x16xf32>
    %16 = vector.broadcast %1 : vector<4x1xf32> to vector<4x16xf32>
    %17 = arith.mulf %16, %15 : vector<4x16xf32>
    %18 = arith.subf %8, %17 : vector<4x16xf32>
    %c0_13 = arith.constant 0 : index
    %c0_14 = arith.constant 0 : index
    %19 = vector.load %arg4[%c0_13, %c0_14] : memref<4x1xf32, #tpu.memory_space<vmem>>, vector<4x1xf32>
    %20 = vector.broadcast %19 : vector<4x1xf32> to vector<4x16xf32>
    %21 = arith.mulf %18, %20 : vector<4x16xf32>
    %c0_15 = arith.constant 0 : index
    %c0_16 = arith.constant 0 : index
    %22 = vector.load %arg8[%c0_15, %c0_16] : memref<4x16xf32, #tpu.memory_space<vmem>>, vector<4x16xf32>
    tpu.vector_store %arg8[%c0_15, %c0_16], %21 {strides = array<i32>} : memref<4x16xf32, #tpu.memory_space<vmem>>, vector<4x16xf32>,
    return
  }
}

</mosaic_0001>

<bundles_post_ra>
// kernel: diff_augmentation_forward.1
= control target key start
LH: loop header
LB: loop body
LE: loop exit
PB: predicated region body
PF: predicated region fallthrough
CT: control target
= control target key end

     0   :  { %v197_v1 = vmov 0   ;;  %v198_v2 = vmov 0.0   ;;  %s276_s0 = inlined_call_operand.vmem [shape: f32[4,16], index: 0, kind: input, shape index: {}]   ;;  %s277_s1 = inlined_call_operand.vmem [shape: f32[4,16], index: 1, kind: input, shape index: {}]   ;;  %s278_s2 = inlined_call_operand.vmem [shape: f32[4,1], index: 2, kind: input, shape index: {}]   ;;  %s279_s3 = inlined_call_operand.vmem [shape: f32[4,1], index: 3, kind: input, shape index: {}]   ;;  %s280_s4 = inlined_call_operand.vmem [shape: f32[4,1], index: 4, kind: input, shape index: {}]   ;;  %s281_s5 = inlined_call_operand.vmem [shape: f32[4,16], index: 5, kind: input, shape index: {}]   ;;  %s282_s6 = inlined_call_operand.vmem [shape: f32[16,16], index: 6, kind: input, shape index: {}]   ;;  %s283_s7 = inlined_call_operand.vmem [shape: f32[1,16], index: 7, kind: input, shape index: {}]   ;;  %s284_s8 = inlined_call_operand.hbm [shape: f32[4,16], index: 8, kind: output, shape index: {}]  }
   0x1   :  { %v30_v0 = vld [vmem:[%s278_s2] sm:$0xf]  ;;  %173 = vset.pattern.permute.xlu0 %v197_v1  ;;  %174 = vset.pattern.permute.xlu1 %v197_v1  ;;  %v48_v3 = vld [vmem:[%s282_s6 + $0x8] sm:$0xff] }
   0x2   :  { %35 = vperm.xlu0 %173, %v30_v0   ;;  %162 = vmatprep.subr.mxu0 %v198_v2 }
   0x3   :  { %13 = vsyncpa [#allocation3], 0  ;;  %v31_v4 = vld [vmem:[%s279_s3] sm:$0xf]  ;;  %163 = vmatpush3.msra.mxu0 %v48_v3  ;;  %vm199_vm0 = vmmov 0   ;;  %vm56_vm1 = vcmask 130048  }
   0x4   :  { %164 = vmatprep.subr.mxu0 %v198_v2  ;;  %v47_v5 = vld [vmem:[%s282_s6] sm:$0xff]  ;;  %166 = vmatprep.mubr.msk.f32.mxu0 %vm199_vm0, %v198_v2  ;;  %vm141_vm2 = vcmask 125952  }
   0x5   :  { %165 = vmatpush3.msra.mxu0 %v47_v5  ;;  %v134_v6 = vld [vmem:[%s280_s4] sm:$0xf] }
   0x6   :  { %42 = vperm.xlu0 %173, %v31_v4   ;;  %137 = vperm.xlu1 %174, %v134_v6   ;;  %v32_v8 = vld [vmem:[%s276_s0] sm:$0xf]  ;;  %s200_s0 = smov [#allocation2]  }
   0x7   :  { %v39_v9 = vld [vmem:[%s277_s1] sm:$0xf]  ;;  %s149_s1 = sshll.u32 %s200_s0, 4  ;;  %s150_s1 = int_to_ptr.vmem [resolvable:$true] %s149_s1 }
   0x8   :  { %v157_v14 = vld [vmem:[%s283_s7] ss:$0 sm:$0xff]  ;;  %s175_s19 = scalar_lea.vmem %s150_s1, 64  ;;  %p180_p1 = scmp.lt.s32.totalorder %s150_s1, %s150_s1 }
   0x9   :  { %v130_v16 = vld [vmem:[%s281_s5] sm:$0xf]  ;;  %p176_p0 = scmp.ne.s32.totalorder %s150_s1, %s175_s19  ;;  %p181_p2 = scmp.lt.s32.totalorder %s175_s19, %s175_s19 }
   0xb   :  { %p182_p3 = por %p181_p2, %p180_p1 }
   0xd   :  { %p183_p4 = pnand %p182_p3, %p176_p0 }
  0x7d   :  { %v36_v7 = vpop.permute.xlu0 %35 }
  0x7e   :  { %v38_v11 = vmul.f32 %v36_v7, %v32_v8 }
  0x81   :  { %v43_v10 = vpop.permute.xlu0 %42  ;;  %v138_v21 = vpop.permute.xlu1 %137 }
  0x82   :  { %v45_v12 = vmul.f32 %v43_v10, %v39_v9 }
  0x84   :  { %v46_v13 = vadd.f32 %v45_v12, %v38_v11 }
  0x86   :  { %167 = vmatmul.mubr.msk.f32.vlgmr.msra.gmra.mxu0 %vm56_vm1, %v46_v13 }
 0x146   :  { %v126_v15 = vpop.f32.mrf.mxu0 }
 0x147   :  { %v127_v17 = vadd.f32 %v157_v14, %v126_v15 }
 0x148   :  { %v168_v18 = vpop.f32.mrf.mxu0 }
 0x149   :  { %v131_v19 = vadd.f32 %v130_v16, %v127_v17 }
 0x14b   :  { %v132_v20 = vmul.f32 %v131_v19, %v43_v10 }
 0x14d   :  { %v133_v22 = vsub.f32 %v46_v13, %v132_v20 }
 0x14f   :  { %v140_v23 = vmul.f32 %v138_v21, %v133_v22 }
 0x151   :  { %142 = vst.msk [vmem:[#allocation2] sm:$0xf] %vm141_vm2, %v140_v23 }
 0x152   :  { %186 = shalt.err (!%p183_p4)
}
 0x153   :  { %152 = dma.vmem_to_hbm [thread:$0]  %s150_s1, 64, %s284_s8, [#allocation3]  }
 0x154   :  { %195 = dma.done.wait [#allocation3], 64  }
 0x155   :  { %196 = vsyncadd [#allocation3], 4294967232 }
 0x156   :  { %156 = vsyncpa [#allocation3], 1 }

</bundles_post_ra>
